<compile_context>
chip_gen: v6e
topology: v6e:2x2x1
jax: 0.10.0
libtpu: 0.0.40
codegen_flags: <defaults>
</compile_context>

<pallas_src>
import math

import jax
import jax.numpy as jnp
from jax import lax
from jax.experimental import pallas as pl
from jax.experimental.pallas import tpu as pltpu

OMEGA = 10.0
EPSILON = 2.0
# C = omega - omega * log(1 + omega/epsilon)
_C = OMEGA - OMEGA * math.log(1.0 + OMEGA / EPSILON)


def _wing_loss_kernel(pred_ref, target_ref, w_ref, out_ref):
    i = pl.program_id(0)
    tile_n = pred_ref.shape[0]

    delta = jnp.abs(target_ref[...].astype(jnp.float32)
                    - pred_ref[...].astype(jnp.float32))
    small = OMEGA * jnp.log1p(delta * (1.0 / EPSILON))   # delta <  omega branch
    big = delta - _C                                     # delta >= omega branch
    loss = jnp.where(delta < OMEGA, small, big)          # (tile_n, M)

    # Reduce M first, then apply weights: tile_n multiplies instead of tile_n*M.
    row_sums = jnp.sum(loss, axis=1, keepdims=True)      # (tile_n, 1)

    # Weights live resident in VMEM as (N_pad, 1); slice this block's rows.
    start = pl.multiple_of(i * tile_n, 8)
    w_tile = w_ref[pl.ds(start, tile_n), :]              # (tile_n, 1)

    partial = jnp.sum(w_tile.astype(jnp.float32) * row_sums)  # scalar

    # Lane-dense (1, 128) partial row: value in lane 0, zeros elsewhere.
    col = lax.broadcasted_iota(jnp.int32, out_ref.shape, 1)
    out_ref[...] = jnp.where(col == 0, partial, jnp.float32(0.0))


def _round_up(x, m):
    return ((x + m - 1) // m) * m


def wing_loss(pred, target, weights, *, target_block_bytes=2 * 1024 * 1024):
    """pred, target: (N, M); weights: (N,). Returns scalar float32 loss."""
    N, M = pred.shape
    assert target.shape == (N, M)
    assert weights.shape == (N,)

    # Rows per tile so each input block is ~target_block_bytes (min 8 rows).
    rows = max(8, (target_block_bytes // (M * 4)) // 8 * 8)
    n_pad8 = _round_up(N, 8)
    if n_pad8 <= rows:
        tile_n = n_pad8          # whole (padded) problem in a single grid step
        n_pad = n_pad8
    else:
        tile_n = rows
        n_pad = _round_up(N, tile_n)
    num_blocks = n_pad // tile_n

    pred = pred.astype(jnp.float32)
    target = target.astype(jnp.float32)
    weights = weights.astype(jnp.float32)
    if n_pad != N:
        pad = n_pad - N
        # Zero padding contributes exactly 0: delta=0 -> loss=0, weight=0.
        pred = jnp.pad(pred, ((0, pad), (0, 0)))
        target = jnp.pad(target, ((0, pad), (0, 0)))
        weights = jnp.pad(weights, ((0, pad),))
    w2d = weights.reshape(n_pad, 1)

    cost = pl.CostEstimate(
        flops=6 * n_pad * M,
        transcendentals=n_pad * M,
        bytes_accessed=2 * n_pad * M * 4 + n_pad * 4 + num_blocks * 128 * 4,
    )

    partials = pl.pallas_call(
        _wing_loss_kernel,
        out_shape=jax.ShapeDtypeStruct((num_blocks, 128), jnp.float32),
        grid_spec=pltpu.PrefetchScalarGridSpec(
            num_scalar_prefetch=0,
            grid=(num_blocks,),
            in_specs=[
                pl.BlockSpec((tile_n, M), lambda i: (i, 0)),    # pred
                pl.BlockSpec((tile_n, M), lambda i: (i, 0)),    # target
                pl.BlockSpec((n_pad, 1), lambda i: (0, 0)),     # weights (resident)
            ],
            # One lane-dense partial row per grid step -> grid can be parallel.
            out_specs=pl.BlockSpec((1, 128), lambda i: (i, 0)),
        ),
        compiler_params=pltpu.CompilerParams(
            dimension_semantics=("parallel",),
            vmem_limit_bytes=32 * 1024 * 1024,
        ),
        cost_estimate=cost,
    )(pred, target, w2d)

    # Glue: tiny final reduce + divide by the ORIGINAL element count
    # (len(loss1) + len(loss2) == N*M in the PyTorch module).
    return (jnp.sum(partials) / jnp.float32(N * M)).astype(jnp.float32)


def _wing_loss_ref(pred, target, weights):
    delta = jnp.abs(target - pred)
    small = OMEGA * jnp.log1p(delta / EPSILON)
    big = delta - _C
    loss = jnp.where(delta < OMEGA, small, big)
    weighted = weights[:, None] * loss
    return jnp.sum(weighted) / (pred.shape[0] * pred.shape[1])


if __name__ == "__main__":
    key = jax.random.PRNGKey(0)
    k1, k2, k3 = jax.random.split(key, 3)

    # Small landmark-style shapes; spread values so both wing branches
    # (delta < omega and delta >= omega) are exercised.
    N, M = 16, 256
    pred = jax.random.normal(k1, (N, M), dtype=jnp.float32) * 8.0
    target = jax.random.normal(k2, (N, M), dtype=jnp.float32) * 8.0
    weights = jax.random.uniform(k3, (N,), dtype=jnp.float32, minval=0.5, maxval=1.5)

    out = wing_loss(pred, target, weights)
    jax.block_until_ready(out)
    ref = _wing_loss_ref(pred, target, weights)
    assert jnp.allclose(out, ref, rtol=1e-5, atol=1e-5), (out, ref)

    # Ragged-N case (exercises the zero-padding path).
    N2, M2 = 13, 128
    pred2 = jax.random.normal(k1, (N2, M2), dtype=jnp.float32) * 8.0
    target2 = jax.random.normal(k2, (N2, M2), dtype=jnp.float32) * 8.0
    weights2 = jax.random.uniform(k3, (N2,), dtype=jnp.float32, minval=0.5, maxval=1.5)

    out2 = wing_loss(pred2, target2, weights2)
    jax.block_until_ready(out2)
    ref2 = _wing_loss_ref(pred2, target2, weights2)
    assert jnp.allclose(out2, ref2, rtol=1e-5, atol=1e-5), (out2, ref2)

    print("KERNEL_OK")
</pallas_src>

<mosaic_0001>
module attributes {stable_mosaic.version = 11 : i64} {
  func.func @_wing_loss_kernel(%arg0: i32, %arg1: memref<16x256xf32, #tpu.memory_space<vmem>>, %arg2: memref<16x256xf32, #tpu.memory_space<vmem>>, %arg3: memref<16x1xf32, #tpu.memory_space<vmem>>, %arg4: memref<1x128xf32, #tpu.memory_space<vmem>>) attributes {dimension_semantics = [#tpu.dimension_semantics<parallel>], iteration_bounds = array<i64: 1>, scalar_prefetch = 0 : i64, scratch_operands = 0 : i64, tpu.core_type = #tpu.core_type<tc>, window_params = [{transform_indices = @transform_0, window_bounds = array<i64: 16, 256>}, {transform_indices = @transform_1, window_bounds = array<i64: 16, 256>}, {pipeline_mode = #tpu.pipeline_mode<synchronous>, transform_indices = @transform_2, window_bounds = array<i64: 16, 1>}, {transform_indices = @transform_3, window_bounds = array<i64: 1, 128>}]} {
    %c0 = arith.constant 0 : index
    %c0_0 = arith.constant 0 : index
    %0 = vector.load %arg2[%c0, %c0_0] : memref<16x256xf32, #tpu.memory_space<vmem>>, vector<16x256xf32>
    %c0_1 = arith.constant 0 : index
    %c0_2 = arith.constant 0 : index
    %1 = vector.load %arg1[%c0_1, %c0_2] : memref<16x256xf32, #tpu.memory_space<vmem>>, vector<16x256xf32>
    %2 = arith.subf %0, %1 : vector<16x256xf32>
    %3 = math.absf %2 : vector<16x256xf32>
    %cst = arith.constant 5.000000e-01 : f32
    %4 = vector.broadcast %cst : f32 to vector<16x256xf32>
    %5 = arith.mulf %3, %4 : vector<16x256xf32>
    %6 = math.log1p %5 : vector<16x256xf32>
    %cst_3 = arith.constant 1.000000e+01 : f32
    %7 = vector.broadcast %cst_3 : f32 to vector<16x256xf32>
    %8 = arith.mulf %7, %6 : vector<16x256xf32>
    %cst_4 = arith.constant -7.9175949 : f32
    %9 = vector.broadcast %cst_4 : f32 to vector<16x256xf32>
    %10 = arith.subf %3, %9 : vector<16x256xf32>
    %cst_5 = arith.constant 1.000000e+01 : f32
    %11 = vector.broadcast %cst_5 : f32 to vector<16x256xf32>
    %12 = arith.cmpf olt, %3, %11 : vector<16x256xf32>
    %13 = arith.select %12, %8, %10 : vector<16x256xi1>, vector<16x256xf32>
    %cst_6 = arith.constant dense<0.000000e+00> : vector<16xf32>
    %14 = vector.multi_reduction <add>, %13, %cst_6 [1] : vector<16x256xf32> to vector<16xf32>
    %15 = vector.shape_cast %14 : vector<16xf32> to vector<16x1xf32>
    %c16_i32 = arith.constant 16 : i32
    %16 = arith.muli %arg0, %c16_i32 : i32
    %17 = tpu.assume_multiple %16, 8 : i32
    %18 = arith.index_cast %17 : i32 to index
    %c0_7 = arith.constant 0 : index
    %19 = vector.load %arg3[%18, %c0_7] : memref<16x1xf32, #tpu.memory_space<vmem>>, vector<16x1xf32>
    %20 = arith.mulf %19, %15 : vector<16x1xf32>
    %21 = vector.shape_cast %20 : vector<16x1xf32> to vector<1x16x1xf32>
    %cst_8 = arith.constant dense<0.000000e+00> : vector<1xf32>
    %22 = vector.multi_reduction <add>, %21, %cst_8 [1, 2] : vector<1x16x1xf32> to vector<1xf32>
    %23 = vector.shape_cast %22 : vector<1xf32> to vector<1x1x1xf32>
    %24 = vector.extract %23[0, 0, 0] : f32 from vector<1x1x1xf32>
    %25 = tpu.iota {dimensions = array<i32: 1>} : vector<1x128xi32>
    %c0_i32 = arith.constant 0 : i32
    %26 = vector.broadcast %c0_i32 : i32 to vector<1x128xi32>
    %27 = arith.cmpi eq, %25, %26 : vector<1x128xi32>
    %cst_9 = arith.constant 0.000000e+00 : f32
    %28 = vector.broadcast %24 : f32 to vector<1x128xf32>
    %29 = vector.broadcast %cst_9 : f32 to vector<1x128xf32>
    %30 = arith.select %27, %28, %29 : vector<1x128xi1>, vector<1x128xf32>
    %c0_10 = arith.constant 0 : index
    %c0_11 = arith.constant 0 : index
    %31 = vector.load %arg4[%c0_10, %c0_11] : memref<1x128xf32, #tpu.memory_space<vmem>>, vector<1x128xf32>
    tpu.vector_store %arg4[%c0_10, %c0_11], %30 {strides = array<i32>} : memref<1x128xf32, #tpu.memory_space<vmem>>, vector<1x128xf32>,
    return
  }
  func.func @transform_0(%arg0: i32) -> (i32, i32) {
    %c0_i32 = arith.constant 0 : i32
    %c0_i32_0 = arith.constant 0 : i32
    return %arg0, %c0_i32 : i32, i32
  }
  func.func @transform_1(%arg0: i32) -> (i32, i32) {
    %c0_i32 = arith.constant 0 : i32
    %c0_i32_0 = arith.constant 0 : i32
    return %arg0, %c0_i32 : i32, i32
  }
  func.func @transform_2(%arg0: i32) -> (i32, i32) {
    %c0_i32 = arith.constant 0 : i32
    %c0_i32_0 = arith.constant 0 : i32
    %c0_i32_1 = arith.constant 0 : i32
    return %c0_i32, %c0_i32_0 : i32, i32
  }
  func.func @transform_3(%arg0: i32) -> (i32, i32) {
    %c0_i32 = arith.constant 0 : i32
    %c0_i32_0 = arith.constant 0 : i32
    return %arg0, %c0_i32 : i32, i32
  }
}

</mosaic_0001>

<bundles_post_ra>
// kernel: tpu_custom_call.1
= control target key start
LH: loop header
LB: loop body
LE: loop exit
PB: predicated region body
PF: predicated region fallthrough
CT: control target
= control target key end

     0   :  { %8 = vsyncpa [#allocation3], 0  ;;  %s300_s0 = inlined_call_operand.hbm [shape: f32[16,256], index: 0, kind: input, shape index: {}]   ;;  %s301_s1 = inlined_call_operand.hbm [shape: f32[16,256], index: 1, kind: input, shape index: {}]   ;;  %s302_s2 = inlined_call_operand.vmem [shape: f32[16,1], index: 2, kind: input, shape index: {}]   ;;  %s303_s3 = inlined_call_operand.hbm [shape: f32[1,128], index: 3, kind: output, shape index: {}]  }
   0x1   :  { %9 = vsyncpa [#allocation6], 0 }
   0x2   :  { %10 = vsyncpa [#allocation4], 0  ;;  %s247_s12 = smov [#allocation2]  }
   0x3   :  { %s16_s13 = sshll.u32 %s247_s12, 4  ;;  %s17_s13 = int_to_ptr.vmem [resolvable:$true] %s16_s13 }
   0x4   :  { %s189_s14 = scalar_lea.vmem %s17_s13, 512  ;;  %p194_p1 = scmp.lt.s32.totalorder %s17_s13, %s17_s13 }
   0x5   :  { %p190_p0 = scmp.ne.s32.totalorder %s17_s13, %s189_s14  ;;  %p195_p2 = scmp.lt.s32.totalorder %s189_s14, %s189_s14 }
   0x7   :  { %p196_p3 = por %p195_p2, %p194_p1 }
   0x9   :  { %p197_p4 = pnand %p196_p3, %p190_p0 }
   0xb   :  { %200 = shalt.err (!%p197_p4)
}
   0xc   :  { %s248_s15 = smov 256   ;;  %s249_s16 = smov 16  }
   0xd   :  { %22 = dma.hbm_to_vmem [thread:$0]  %s300_s0, 512, %s17_s13, [#allocation3], %s248_s15, %s248_s15, %s249_s16  }
   0xe   :  { %s250_s19 = smov [#allocation5]  }
   0xf   :  { %s28_s20 = sshll.u32 %s250_s19, 4  ;;  %s29_s20 = int_to_ptr.vmem [resolvable:$true] %s28_s20 }
  0x10   :  { %s209_s21 = scalar_lea.vmem %s29_s20, 512  ;;  %p214_p6 = scmp.lt.s32.totalorder %s29_s20, %s29_s20 }
  0x11   :  { %p210_p5 = scmp.ne.s32.totalorder %s29_s20, %s209_s21  ;;  %p215_p7 = scmp.lt.s32.totalorder %s209_s21, %s209_s21 }
  0x13   :  { %p216_p8 = por %p215_p7, %p214_p6 }
  0x15   :  { %p217_p9 = pnand %p216_p8, %p210_p5 }
  0x17   :  { %220 = shalt.err (!%p217_p9)
}
  0x18   :  { %34 = dma.hbm_to_vmem [thread:$0]  %s301_s1, 512, %s29_s20, [#allocation6], %s248_s15, %s248_s15, %s249_s16  }
  0x19   :  { %241 = dma.done.wait [#allocation3], 512  }
  0x1a   :  { %242 = vsyncadd [#allocation3], 4294966784 }
  0x1b   :  { %243 = dma.done.wait [#allocation6], 512  }
  0x1c   :  { %244 = vsyncadd [#allocation6], 4294966784  ;;  %v43_v0 = vld [vmem:[#allocation5] sm:$0xff]  ;;  %v44_v1 = vld [vmem:[#allocation5 + $0x8] sm:$0xff]  ;;  %vm127_vm8 = vcmask 7168   ;;  %s251_s26 = smov [#allocation7]  }
  0x1d   :  { %v47_v2 = vld [vmem:[#allocation2] sm:$0xff]  ;;  %v48_v3 = vld [vmem:[#allocation2 + $0x8] sm:$0xff]  ;;  %v45_v5 = vld [vmem:[#allocation5 + $0x10] sm:$0xff] }
  0x1e   :  { %v51_v4 = vsub.f32 %v43_v0, %v47_v2  ;;  %v46_v6 = vld [vmem:[#allocation5 + $0x18] sm:$0xff]  ;;  %v52_v7 = vsub.f32 %v44_v1, %v48_v3  ;;  %v49_v8 = vld [vmem:[#allocation2 + $0x10] sm:$0xff] }
  0x1f   :  { %v50_v9 = vld [vmem:[#allocation2 + $0x18] sm:$0xff]  ;;  %v53_v11 = vsub.f32 %v45_v5, %v49_v8 }
  0x20   :  { %v55_v10 = vand.u32 2147483647, %v51_v4  ;;  %v54_v12 = vsub.f32 %v46_v6, %v50_v9  ;;  %v56_v13 = vand.u32 2147483647, %v52_v7  ;;  %v123_v4 = vld [vmem:[%s302_s2] sm:$0xff]  ;;  %v124_v6 = vld [vmem:[%s302_s2 + $0x8] sm:$0xff] }
  0x21   :  { %v57_v15 = vand.u32 2147483647, %v53_v11  ;;  %s152_s2 = sshll.u32 %s251_s26, 4  ;;  %s153_s2 = int_to_ptr.vmem [resolvable:$true] %s152_s2 }
  0x22   :  { %v59_v14 = vmul.f32 0.5, %v55_v10  ;;  %v60_v16 = vmul.f32 0.5, %v56_v13  ;;  %v58_v17 = vand.u32 2147483647, %v54_v12  ;;  %v162_v39 = vadd.f32 7.917595, %v55_v10  ;;  %p226_p11 = scmp.lt.s32.totalorder %s153_s2, %s153_s2 }
  0x23   :  { %v61_v19 = vmul.f32 0.5, %v57_v15  ;;  %vm107_vm2 = vcmp.lt.f32.partialorder %v55_v10, 10.0  ;;  %v163_v47 = vadd.f32 7.917595, %v56_v13  ;;  %vm108_vm4 = vcmp.lt.f32.partialorder %v56_v13, 10.0  ;;  %s221_s28 = scalar_lea.vmem %s153_s2, 16 }
  0x24   :  { %v63_v18 = vadd.f32 1.0, %v59_v14  ;;  %v72_v20 = vadd.f32 1.0, %v60_v16  ;;  %v62_v21 = vmul.f32 0.5, %v58_v17  ;;  %v66_v24 = vmul.f32 -0.5, %v59_v14  ;;  %p222_p10 = scmp.ne.s32.totalorder %s153_s2, %s221_s28  ;;  %s225_s29 = scalar_lea.vmem %s153_s2, 32 }
  0x25   :  { %v81_v22 = vadd.f32 1.0, %v61_v19  ;;  %v75_v25 = vmul.f32 -0.5, %v60_v16  ;;  %v84_v26 = vmul.f32 -0.5, %v61_v19  ;;  %v69_v29 = vand.u32 2147483647, %v59_v14  ;;  %p227_p12 = scmp.lt.s32.totalorder %s225_s29, %s221_s28 }
  0x26   :  { %173 = vlog2.f32 %v63_v18  ;;  %v90_v23 = vadd.f32 1.0, %v62_v21  ;;  %v67_v27 = vadd.f32 1.0, %v66_v24  ;;  %v93_v28 = vmul.f32 -0.5, %v62_v21 }
  0x27   :  { %175 = vlog2.f32 %v72_v20  ;;  %v76_v30 = vadd.f32 1.0, %v75_v25  ;;  %v78_v31 = vand.u32 2147483647, %v60_v16  ;;  %v85_v32 = vadd.f32 1.0, %v84_v26  ;;  %p228_p13 = por %p227_p12, %p226_p11 }
  0x28   :  { %177 = vlog2.f32 %v81_v22  ;;  %v87_v33 = vand.u32 2147483647, %v61_v19  ;;  %v68_v34 = vmul.f32 %v67_v27, %v59_v14  ;;  %v94_v35 = vadd.f32 1.0, %v93_v28 }
  0x29   :  { %179 = vlog2.f32 %v90_v23  ;;  %vm278_vm0 = vcmp.lt.f32.partialorder %v69_v29, 0.0004427343  ;;  %v77_v38 = vmul.f32 %v76_v30, %v60_v16  ;;  %v96_v40 = vand.u32 2147483647, %v62_v21  ;;  %p229_p0 = pnand %p228_p13, %p222_p10 }
  0x2a   :  { %vm282_vm1 = vcmp.lt.f32.partialorder %v78_v31, 0.0004427343  ;;  %v86_v44 = vmul.f32 %v85_v32, %v61_v19  ;;  %vm88_vm3 = vcmp.lt.f32.partialorder %v87_v33, 0.0004427343  ;;  %v95_v50 = vmul.f32 %v94_v35, %v62_v21 }
  0x2b   :  { %vm97_vm5 = vcmp.lt.f32.partialorder %v96_v40, 0.0004427343  ;;  %v164_v54 = vadd.f32 7.917595, %v57_v15  ;;  %vm109_vm6 = vcmp.lt.f32.partialorder %v57_v15, 10.0  ;;  %vm110_vm7 = vcmp.lt.f32.partialorder %v58_v17, 10.0 }
  0x2c   :  { %v165_v60 = vadd.f32 7.917595, %v58_v17  ;;  %v140_v20 = vlaneseq }
  0x2e   :  { %v141_v21 = vand.u32 127, %v140_v20 }
  0x30   :  { %vm142_vm9 = vcmp.eq.s32.totalorder %v141_v21, 0 }
  0x33   :  { %v174_v36 = vpop.eup %173 }
  0x34   :  { %v176_v41 = vpop.eup %175  ;;  %v65_v42 = vmul.f32 0.6931472, %v174_v36 }
  0x35   :  { %v178_v45 = vpop.eup %177  ;;  %v74_v46 = vmul.f32 0.6931472, %v176_v41 }
  0x36   :  { %v71_v48 = vsel %vm278_vm0, %v68_v34, %v65_v42  ;;  %v83_v49 = vmul.f32 0.6931472, %v178_v45  ;;  %v180_v51 = vpop.eup %179 }
  0x37   :  { %v80_v52 = vsel %vm282_vm1, %v77_v38, %v74_v46  ;;  %v99_v53 = vmul.f32 10.0, %v71_v48  ;;  %v92_v57 = vmul.f32 0.6931472, %v180_v51 }
  0x38   :  { %v100_v55 = vmul.f32 10.0, %v80_v52  ;;  %v89_v56 = vsel %vm88_vm3, %v86_v44, %v83_v49 }
  0x39   :  { %v111_v58 = vsel %vm107_vm2, %v99_v53, %v162_v39  ;;  %v101_v59 = vmul.f32 10.0, %v89_v56  ;;  %v98_v62 = vsel %vm97_vm5, %v95_v50, %v92_v57 }
  0x3a   :  { %v112_v61 = vsel %vm108_vm4, %v100_v55, %v163_v47  ;;  %v102_v0 = vmul.f32 10.0, %v98_v62 }
  0x3b   :  { %v115_v63 = vadd.f32 %v112_v61, %v111_v58  ;;  %v113_v1 = vsel %vm109_vm6, %v101_v59, %v164_v54 }
  0x3c   :  { %v114_v2 = vsel %vm110_vm7, %v102_v0, %v165_v60 }
  0x3d   :  { %116 = vadd.xlane.f32.xlu0 %v115_v63  ;;  %v118_v3 = vadd.f32 %v114_v2, %v113_v1 }
  0x41   :  { %119 = vadd.xlane.f32.xlu0 %v118_v3 }
  0xc6   :  { %v117_v5 = vpop.xlane.xlu0 %116 }
  0xc7   :  { %v125_v7 = vmul.f32 %v123_v4, %v117_v5 }
  0xc9   :  { %v128_v10 = vsel %vm127_vm8, %v125_v7, 0.0 }
  0xca   :  { %v120_v8 = vpop.xlane.xlu0 %119 }
  0xcb   :  { %v126_v9 = vmul.f32 %v124_v6, %v120_v8 }
  0xcd   :  { %v129_v11 = vsel %vm127_vm8, %v126_v9, 0.0 }
  0xce   :  { %v130_v12 = vadd.f32 %v129_v11, %v128_v10 }
  0xd0   :  { %131 = vadd.xlane.f32.xlu1 %v130_v12 }
 0x159   :  { %v132_v13 = vpop.xlane.xlu1 %131 }
 0x15a   :  { %v133_v14 = vrot.slane %v132_v13, 4 }
 0x15c   :  { %v134_v15 = vadd.f32 %v133_v14, %v132_v13 }
 0x15e   :  { %v135_v16 = vrot.slane %v134_v15, 2 }
 0x160   :  { %v136_v17 = vadd.f32 %v135_v16, %v134_v15 }
 0x162   :  { %v137_v18 = vrot.slane %v136_v17, 1 }
 0x164   :  { %v138_v19 = vadd.f32 %v137_v18, %v136_v17 }
 0x166   :  { %166 = vpush %v138_v19 }
 0x197   :  { %s167_s27 = spop %166 }
 0x198   :  { %v143_v22 = vstv %s167_s27 }
 0x199   :  { %v144_v23 = vsel %vm142_vm9, %v143_v22, 0.0 }
 0x19a   :  { %145 = vst [vmem:[#allocation7] sm:$0x1] %v144_v23 }
 0x19b   :  { %232 = shalt.err (!%p229_p0)
}
 0x19c   :  { %155 = dma.vmem_to_hbm [thread:$0]  %s153_s2, 16, %s303_s3, [#allocation4]  }
 0x19d   :  { %245 = dma.done.wait [#allocation4], 16  }
 0x19e   :  { %246 = vsyncadd [#allocation4], 4294967280 }
 0x19f   :  { %159 = vsyncpa [#allocation3], 1 }
 0x1a0   :  { %160 = vsyncpa [#allocation6], 1 }
 0x1a1   :  { %161 = vsyncpa [#allocation4], 1 }

</bundles_post_ra>
